<compile_context>
chip_gen: v6e
topology: v6e:2x2x1
jax: 0.10.0
libtpu: 0.0.40
codegen_flags: <defaults>
</compile_context>

<pallas_src>
import jax
import jax.numpy as jnp
from jax.experimental import pallas as pl
from jax.experimental.pallas import tpu as pltpu

EPS = 1e-6


def _round_up(n, m):
    return ((n + m - 1) // m) * m


def residual_connection_kernel(x_ref, gamma_ref, beta_ref, w_ref, b_ref, o_ref):
    # x_ref: (tile_rows, d_model)   gamma/beta/b: (1, d_model) f32
    # w_ref: (d_model, d_model) bf16
    x = x_ref[...].astype(jnp.float32)

    # --- LayerNorm over the feature dim (biased variance, eps inside rsqrt).
    # Keep statistics and elementwise math in f32 (v5e has no bf16 VPU/EUP).
    mean = jnp.mean(x, axis=-1, keepdims=True)
    centered = x - mean
    var = jnp.mean(centered * centered, axis=-1, keepdims=True)
    y = centered * jax.lax.rsqrt(var + EPS) * gamma_ref[...] + beta_ref[...]

    # --- Sublayer: Linear(d_model, d_model). bf16 operands hit the MXU fast path;
    # accumulation stays f32 via preferred_element_type.
    z = jnp.dot(y.astype(jnp.bfloat16), w_ref[...],
                preferred_element_type=jnp.float32)
    z = z + b_ref[...]

    # --- dropout (inference: identity) + residual add.
    # TODO(synk): training-mode dropout mask via pltpu.prng_* not implemented.
    o_ref[...] = (x + z).astype(o_ref.dtype)


def _pick_tile_rows(rows, requested, row_multiple):
    """Largest tile <= requested, multiple of the sublane packing, and (when the
    data allows it) keeping >= 2 grid steps so v7x's 2 TensorCores both get work."""
    tr = max(row_multiple, min(requested, _round_up(rows, row_multiple)))
    tr = _round_up(tr, row_multiple)
    if rows > row_multiple and pl.cdiv(rows, tr) < 2:
        tr = _round_up(pl.cdiv(rows, 2), row_multiple)
    return tr


def _build_specs(tile_rows, d_model, single_buffer_consts):
    const_kwargs = {}
    if single_buffer_consts:
        # gamma/beta/W/bias have a constant block index: a single VMEM buffer
        # suffices, halving W's resident footprint (important on v7x's 64 MiB VMEM).
        const_kwargs = dict(pipeline_mode=pl.Buffered(buffer_count=1))
    in_specs = [
        pl.BlockSpec((tile_rows, d_model), lambda i: (i, 0)),                 # x rows
        pl.BlockSpec((1, d_model), lambda i: (0, 0), **const_kwargs),         # gamma
        pl.BlockSpec((1, d_model), lambda i: (0, 0), **const_kwargs),         # beta
        pl.BlockSpec((d_model, d_model), lambda i: (0, 0), **const_kwargs),   # W (bf16)
        pl.BlockSpec((1, d_model), lambda i: (0, 0), **const_kwargs),         # bias
    ]
    out_specs = pl.BlockSpec((tile_rows, d_model), lambda i: (i, 0))
    return in_specs, out_specs


def residual_connection(x, gamma, beta, w, b, *, tile_rows=512):
    """out = x + Linear(LayerNorm(x));  x: (batch, seq, d_model) -> same shape.

    For best performance d_model should be a multiple of 128 (lane-dense stores);
    the kernel stays correct for other d_model since blocks span the full feature dim.
    """
    batch, seq, d_model = x.shape
    rows = batch * seq

    row_multiple = 16 if x.dtype in (jnp.bfloat16, jnp.float16) else 8
    tile_rows = _pick_tile_rows(rows, tile_rows, row_multiple)
    padded_rows = _round_up(rows, tile_rows)

    x2d = x.reshape(rows, d_model)
    if padded_rows != rows:
        # Ragged batch*seq: pad with zeros (LN of a zero row is finite thanks to eps),
        # padded rows are sliced off below.
        x2d = jnp.pad(x2d, ((0, padded_rows - rows), (0, 0)))

    # Hoist constant-operand casts out of the kernel (done once here instead of
    # once per grid step), and pre-cast W to bf16 for the MXU (halves its VMEM/HBM bytes).
    gamma2d = jnp.asarray(gamma, jnp.float32).reshape(1, d_model)
    beta2d = jnp.asarray(beta, jnp.float32).reshape(1, d_model)
    b2d = jnp.asarray(b, jnp.float32).reshape(1, d_model)
    w_bf16 = jnp.asarray(w, jnp.bfloat16)

    grid = (padded_rows // tile_rows,)

    # VMEM budget: double-buffered x/out row tiles + W (budgeted at 2x to also cover
    # the double-buffered fallback) + tiny per-feature vectors, 1.5x headroom,
    # capped at 64 MiB (<= physical VMEM on v5e/v6e/v7x).
    itemsize = max(jnp.dtype(x.dtype).itemsize, 4)
    tile_bytes = tile_rows * d_model * itemsize
    budget = 4 * tile_bytes + 2 * d_model * d_model * 2 + 6 * d_model * 4
    vmem_limit = int(min(64 * 1024 * 1024, max(32 * 1024 * 1024, budget * 3 // 2)))

    def run(single_buffer_consts):
        in_specs, out_specs = _build_specs(tile_rows, d_model, single_buffer_consts)
        call = pl.pallas_call(
            residual_connection_kernel,
            out_shape=jax.ShapeDtypeStruct((padded_rows, d_model), x.dtype),
            grid_spec=pltpu.PrefetchScalarGridSpec(
                num_scalar_prefetch=0,
                grid=grid,
                in_specs=in_specs,
                out_specs=out_specs,
            ),
            compiler_params=pltpu.CompilerParams(
                dimension_semantics=("parallel",),   # row axis shards across v7x's 2 TCs
                vmem_limit_bytes=vmem_limit,
            ),
        )
        return call(x2d, gamma2d, beta2d, w_bf16, b2d)

    try:
        out2d = run(single_buffer_consts=True)
    except Exception:
        # JAX build without pipeline_mode single-buffering support: fall back to the
        # default double-buffered constant operands (identical numerics).
        out2d = run(single_buffer_consts=False)

    if padded_rows != rows:
        out2d = out2d[:rows]
    return out2d.reshape(batch, seq, d_model)


def reference(x, gamma, beta, w, b):
    """Pure-JAX reference mirroring the kernel's precision choices (bf16 matmul)."""
    xf = x.astype(jnp.float32)
    mean = jnp.mean(xf, axis=-1, keepdims=True)
    var = jnp.mean((xf - mean) ** 2, axis=-1, keepdims=True)
    y = (xf - mean) * jax.lax.rsqrt(var + EPS) * gamma + beta
    z = jnp.einsum(
        "bsd,de->bse",
        y.astype(jnp.bfloat16), w.astype(jnp.bfloat16),
        preferred_element_type=jnp.float32,
    ) + b
    return (xf + z).astype(x.dtype)


if __name__ == "__main__":
    key = jax.random.PRNGKey(0)
    batch, seq, d_model = 2, 8, 128  # lane-dense feature dim (multiple of 128)

    kx, kw, kb, kg, kbeta = jax.random.split(key, 5)
    x = jax.random.normal(kx, (batch, seq, d_model), dtype=jnp.float32)

    # LayerNorm affine params (perturbed from PyTorch's default 1/0 init for coverage).
    gamma = 1.0 + 0.1 * jax.random.normal(kg, (d_model,), dtype=jnp.float32)
    beta = 0.05 * jax.random.normal(kbeta, (d_model,), dtype=jnp.float32)

    # Deterministic sublayer (Linear d_model -> d_model) params.
    w = jax.random.normal(kw, (d_model, d_model), dtype=jnp.float32) * 0.02
    b = jax.random.normal(kb, (d_model,), dtype=jnp.float32) * 0.01

    out = jax.block_until_ready(residual_connection(x, gamma, beta, w, b))
    ref = jax.block_until_ready(reference(x, gamma, beta, w, b))

    assert out.shape == (batch, seq, d_model)
    max_err = float(jnp.max(jnp.abs(out - ref)))
    assert jnp.allclose(out, ref, atol=5e-3, rtol=5e-3), f"mismatch vs reference: {max_err}"

    print("KERNEL_OK")
</pallas_src>

<mosaic_0001>
module attributes {stable_mosaic.version = 11 : i64} {
  func.func @residual_connection_kernel(%arg0: i32, %arg1: memref<8x128xf32, #tpu.memory_space<vmem>>, %arg2: memref<1x128xf32, #tpu.memory_space<vmem>>, %arg3: memref<1x128xf32, #tpu.memory_space<vmem>>, %arg4: memref<128x128xbf16, #tpu.memory_space<vmem>>, %arg5: memref<1x128xf32, #tpu.memory_space<vmem>>, %arg6: memref<8x128xf32, #tpu.memory_space<vmem>>) attributes {dimension_semantics = [#tpu.dimension_semantics<parallel>], iteration_bounds = array<i64: 2>, scalar_prefetch = 0 : i64, scratch_operands = 0 : i64, tpu.core_type = #tpu.core_type<tc>, window_params = [{transform_indices = @transform_0, window_bounds = array<i64: 8, 128>}, {pipeline_mode = #tpu.pipeline_mode<synchronous>, transform_indices = @transform_1, window_bounds = array<i64: 1, 128>}, {pipeline_mode = #tpu.pipeline_mode<synchronous>, transform_indices = @transform_2, window_bounds = array<i64: 1, 128>}, {pipeline_mode = #tpu.pipeline_mode<synchronous>, transform_indices = @transform_3, window_bounds = array<i64: 128, 128>}, {pipeline_mode = #tpu.pipeline_mode<synchronous>, transform_indices = @transform_4, window_bounds = array<i64: 1, 128>}, {transform_indices = @transform_5, window_bounds = array<i64: 8, 128>}]} {
    %c0 = arith.constant 0 : index
    %c0_0 = arith.constant 0 : index
    %0 = vector.load %arg1[%c0, %c0_0] : memref<8x128xf32, #tpu.memory_space<vmem>>, vector<8x128xf32>
    %cst = arith.constant dense<0.000000e+00> : vector<8xf32>
    %1 = vector.multi_reduction <add>, %0, %cst [1] : vector<8x128xf32> to vector<8xf32>
    %2 = vector.shape_cast %1 : vector<8xf32> to vector<8x1xf32>
    %cst_1 = arith.constant 1.280000e+02 : f32
    %3 = vector.broadcast %cst_1 : f32 to vector<8x1xf32>
    %4 = arith.divf %2, %3 : vector<8x1xf32>
    %5 = vector.broadcast %4 : vector<8x1xf32> to vector<8x128xf32>
    %6 = arith.subf %0, %5 : vector<8x128xf32>
    %7 = arith.mulf %6, %6 : vector<8x128xf32>
    %cst_2 = arith.constant dense<0.000000e+00> : vector<8xf32>
    %8 = vector.multi_reduction <add>, %7, %cst_2 [1] : vector<8x128xf32> to vector<8xf32>
    %9 = vector.shape_cast %8 : vector<8xf32> to vector<8x1xf32>
    %cst_3 = arith.constant 1.280000e+02 : f32
    %10 = vector.broadcast %cst_3 : f32 to vector<8x1xf32>
    %11 = arith.divf %9, %10 : vector<8x1xf32>
    %cst_4 = arith.constant 9.99999997E-7 : f32
    %12 = vector.broadcast %cst_4 : f32 to vector<8x1xf32>
    %13 = arith.addf %11, %12 : vector<8x1xf32>
    %14 = math.rsqrt %13 : vector<8x1xf32>
    %15 = vector.broadcast %14 : vector<8x1xf32> to vector<8x128xf32>
    %16 = arith.mulf %6, %15 : vector<8x128xf32>
    %c0_5 = arith.constant 0 : index
    %c0_6 = arith.constant 0 : index
    %17 = vector.load %arg2[%c0_5, %c0_6] : memref<1x128xf32, #tpu.memory_space<vmem>>, vector<1x128xf32>
    %18 = vector.broadcast %17 : vector<1x128xf32> to vector<8x128xf32>
    %19 = arith.mulf %16, %18 : vector<8x128xf32>
    %c0_7 = arith.constant 0 : index
    %c0_8 = arith.constant 0 : index
    %20 = vector.load %arg3[%c0_7, %c0_8] : memref<1x128xf32, #tpu.memory_space<vmem>>, vector<1x128xf32>
    %21 = vector.broadcast %20 : vector<1x128xf32> to vector<8x128xf32>
    %22 = arith.addf %19, %21 : vector<8x128xf32>
    %23 = arith.truncf %22 : vector<8x128xf32> to vector<8x128xbf16>
    %c0_9 = arith.constant 0 : index
    %c0_10 = arith.constant 0 : index
    %24 = vector.load %arg4[%c0_9, %c0_10] : memref<128x128xbf16, #tpu.memory_space<vmem>>, vector<128x128xbf16>
    %cst_11 = arith.constant dense<0.000000e+00> : vector<8x128xf32>
    %25 = tpu.matmul %23, %24, %cst_11 {dimension_numbers = #tpu.dot_dimension_numbers<[1], [0], [0], [1], [0, 0, 1, 1], [], []>} : vector<8x128xbf16>, vector<128x128xbf16>, vector<8x128xf32> -> vector<8x128xf32>
    %c0_12 = arith.constant 0 : index
    %c0_13 = arith.constant 0 : index
    %26 = vector.load %arg5[%c0_12, %c0_13] : memref<1x128xf32, #tpu.memory_space<vmem>>, vector<1x128xf32>
    %27 = vector.broadcast %26 : vector<1x128xf32> to vector<8x128xf32>
    %28 = arith.addf %25, %27 : vector<8x128xf32>
    %29 = arith.addf %0, %28 : vector<8x128xf32>
    %c0_14 = arith.constant 0 : index
    %c0_15 = arith.constant 0 : index
    %30 = vector.load %arg6[%c0_14, %c0_15] : memref<8x128xf32, #tpu.memory_space<vmem>>, vector<8x128xf32>
    tpu.vector_store %arg6[%c0_14, %c0_15], %29 {strides = array<i32>} : memref<8x128xf32, #tpu.memory_space<vmem>>, vector<8x128xf32>,
    return
  }
  func.func @transform_0(%arg0: i32) -> (i32, i32) {
    %c0_i32 = arith.constant 0 : i32
    %c0_i32_0 = arith.constant 0 : i32
    return %arg0, %c0_i32 : i32, i32
  }
  func.func @transform_1(%arg0: i32) -> (i32, i32) {
    %c0_i32 = arith.constant 0 : i32
    %c0_i32_0 = arith.constant 0 : i32
    %c0_i32_1 = arith.constant 0 : i32
    return %c0_i32, %c0_i32_0 : i32, i32
  }
  func.func @transform_2(%arg0: i32) -> (i32, i32) {
    %c0_i32 = arith.constant 0 : i32
    %c0_i32_0 = arith.constant 0 : i32
    %c0_i32_1 = arith.constant 0 : i32
    return %c0_i32, %c0_i32_0 : i32, i32
  }
  func.func @transform_3(%arg0: i32) -> (i32, i32) {
    %c0_i32 = arith.constant 0 : i32
    %c0_i32_0 = arith.constant 0 : i32
    %c0_i32_1 = arith.constant 0 : i32
    return %c0_i32, %c0_i32_0 : i32, i32
  }
  func.func @transform_4(%arg0: i32) -> (i32, i32) {
    %c0_i32 = arith.constant 0 : i32
    %c0_i32_0 = arith.constant 0 : i32
    %c0_i32_1 = arith.constant 0 : i32
    return %c0_i32, %c0_i32_0 : i32, i32
  }
  func.func @transform_5(%arg0: i32) -> (i32, i32) {
    %c0_i32 = arith.constant 0 : i32
    %c0_i32_0 = arith.constant 0 : i32
    return %arg0, %c0_i32 : i32, i32
  }
}

module attributes {stable_mosaic.version = 11 : i64} {
  func.func @residual_connection_kernel(%arg0: i32, %arg1: memref<8x128xf32, #tpu.memory_space<vmem>>, %arg2: memref<1x128xf32, #tpu.memory_space<vmem>>, %arg3: memref<1x128xf32, #tpu.memory_space<vmem>>, %arg4: memref<128x128xbf16, #tpu.memory_space<vmem>>, %arg5: memref<1x128xf32, #tpu.memory_space<vmem>>, %arg6: memref<8x128xf32, #tpu.memory_space<vmem>>) attributes {dimension_semantics = [#tpu.dimension_semantics<parallel>], iteration_bounds = array<i64: 2>, scalar_prefetch = 0 : i64, scratch_operands = 0 : i64, tpu.core_type = #tpu.core_type<tc>, window_params = [{transform_indices = @transform_0, window_bounds = array<i64: 8, 128>}, {pipeline_mode = #tpu.pipeline_mode<synchronous>, transform_indices = @transform_1, window_bounds = array<i64: 1, 128>}, {pipeline_mode = #tpu.pipeline_mode<synchronous>, transform_indices = @transform_2, window_bounds = array<i64: 1, 128>}, {pipeline_mode = #tpu.pipeline_mode<synchronous>, transform_indices = @transform_3, window_bounds = array<i64: 128, 128>}, {pipeline_mode = #tpu.pipeline_mode<synchronous>, transform_indices = @transform_4, window_bounds = array<i64: 1, 128>}, {transform_indices = @transform_5, window_bounds = array<i64: 8, 128>}]} {
    %c0 = arith.constant 0 : index
    %c0_0 = arith.constant 0 : index
    %0 = vector.load %arg1[%c0, %c0_0] : memref<8x128xf32, #tpu.memory_space<vmem>>, vector<8x128xf32>
    %cst = arith.constant dense<0.000000e+00> : vector<8xf32>
    %1 = vector.multi_reduction <add>, %0, %cst [1] : vector<8x128xf32> to vector<8xf32>
    %2 = vector.shape_cast %1 : vector<8xf32> to vector<8x1xf32>
    %cst_1 = arith.constant 1.280000e+02 : f32
    %3 = vector.broadcast %cst_1 : f32 to vector<8x1xf32>
    %4 = arith.divf %2, %3 : vector<8x1xf32>
    %5 = vector.broadcast %4 : vector<8x1xf32> to vector<8x128xf32>
    %6 = arith.subf %0, %5 : vector<8x128xf32>
    %7 = arith.mulf %6, %6 : vector<8x128xf32>
    %cst_2 = arith.constant dense<0.000000e+00> : vector<8xf32>
    %8 = vector.multi_reduction <add>, %7, %cst_2 [1] : vector<8x128xf32> to vector<8xf32>
    %9 = vector.shape_cast %8 : vector<8xf32> to vector<8x1xf32>
    %cst_3 = arith.constant 1.280000e+02 : f32
    %10 = vector.broadcast %cst_3 : f32 to vector<8x1xf32>
    %11 = arith.divf %9, %10 : vector<8x1xf32>
    %cst_4 = arith.constant 9.99999997E-7 : f32
    %12 = vector.broadcast %cst_4 : f32 to vector<8x1xf32>
    %13 = arith.addf %11, %12 : vector<8x1xf32>
    %14 = math.rsqrt %13 : vector<8x1xf32>
    %15 = vector.broadcast %14 : vector<8x1xf32> to vector<8x128xf32>
    %16 = arith.mulf %6, %15 : vector<8x128xf32>
    %c0_5 = arith.constant 0 : index
    %c0_6 = arith.constant 0 : index
    %17 = vector.load %arg2[%c0_5, %c0_6] : memref<1x128xf32, #tpu.memory_space<vmem>>, vector<1x128xf32>
    %18 = vector.broadcast %17 : vector<1x128xf32> to vector<8x128xf32>
    %19 = arith.mulf %16, %18 : vector<8x128xf32>
    %c0_7 = arith.constant 0 : index
    %c0_8 = arith.constant 0 : index
    %20 = vector.load %arg3[%c0_7, %c0_8] : memref<1x128xf32, #tpu.memory_space<vmem>>, vector<1x128xf32>
    %21 = vector.broadcast %20 : vector<1x128xf32> to vector<8x128xf32>
    %22 = arith.addf %19, %21 : vector<8x128xf32>
    %23 = arith.truncf %22 : vector<8x128xf32> to vector<8x128xbf16>
    %c0_9 = arith.constant 0 : index
    %c0_10 = arith.constant 0 : index
    %24 = vector.load %arg4[%c0_9, %c0_10] : memref<128x128xbf16, #tpu.memory_space<vmem>>, vector<128x128xbf16>
    %cst_11 = arith.constant dense<0.000000e+00> : vector<8x128xf32>
    %25 = tpu.matmul %23, %24, %cst_11 {dimension_numbers = #tpu.dot_dimension_numbers<[1], [0], [0], [1], [0, 0, 1, 1], [], []>} : vector<8x128xbf16>, vector<128x128xbf16>, vector<8x128xf32> -> vector<8x128xf32>
    %c0_12 = arith.constant 0 : index
    %c0_13 = arith.constant 0 : index
    %26 = vector.load %arg5[%c0_12, %c0_13] : memref<1x128xf32, #tpu.memory_space<vmem>>, vector<1x128xf32>
    %27 = vector.broadcast %26 : vector<1x128xf32> to vector<8x128xf32>
    %28 = arith.addf %25, %27 : vector<8x128xf32>
    %29 = arith.addf %0, %28 : vector<8x128xf32>
    %c0_14 = arith.constant 0 : index
    %c0_15 = arith.constant 0 : index
    %30 = vector.load %arg6[%c0_14, %c0_15] : memref<8x128xf32, #tpu.memory_space<vmem>>, vector<8x128xf32>
    tpu.vector_store %arg6[%c0_14, %c0_15], %29 {strides = array<i32>} : memref<8x128xf32, #tpu.memory_space<vmem>>, vector<8x128xf32>,
    return
  }
  func.func @transform_0(%arg0: i32) -> (i32, i32) {
    %c0_i32 = arith.constant 0 : i32
    %c0_i32_0 = arith.constant 0 : i32
    return %arg0, %c0_i32 : i32, i32
  }
  func.func @transform_1(%arg0: i32) -> (i32, i32) {
    %c0_i32 = arith.constant 0 : i32
    %c0_i32_0 = arith.constant 0 : i32
    %c0_i32_1 = arith.constant 0 : i32
    return %c0_i32, %c0_i32_0 : i32, i32
  }
  func.func @transform_2(%arg0: i32) -> (i32, i32) {
    %c0_i32 = arith.constant 0 : i32
    %c0_i32_0 = arith.constant 0 : i32
    %c0_i32_1 = arith.constant 0 : i32
    return %c0_i32, %c0_i32_0 : i32, i32
  }
  func.func @transform_3(%arg0: i32) -> (i32, i32) {
    %c0_i32 = arith.constant 0 : i32
    %c0_i32_0 = arith.constant 0 : i32
    %c0_i32_1 = arith.constant 0 : i32
    return %c0_i32, %c0_i32_0 : i32, i32
  }
  func.func @transform_4(%arg0: i32) -> (i32, i32) {
    %c0_i32 = arith.constant 0 : i32
    %c0_i32_0 = arith.constant 0 : i32
    %c0_i32_1 = arith.constant 0 : i32
    return %c0_i32, %c0_i32_0 : i32, i32
  }
  func.func @transform_5(%arg0: i32) -> (i32, i32) {
    %c0_i32 = arith.constant 0 : i32
    %c0_i32_0 = arith.constant 0 : i32
    return %arg0, %c0_i32 : i32, i32
  }
}

</mosaic_0001>

<bundles_post_ra>
// kernel: tpu_custom_call.1
= control target key start
LH: loop header
LB: loop body
LE: loop exit
PB: predicated region body
PF: predicated region fallthrough
CT: control target
= control target key end

     0   :  { %10 = vsyncpa [#allocation3], 0  ;;  %s958_s0 = inlined_call_operand.hbm [shape: f32[16,128], index: 0, kind: input, shape index: {}]   ;;  %s959_s1 = inlined_call_operand.vmem [shape: f32[1,128], index: 1, kind: input, shape index: {}]   ;;  %s960_s2 = inlined_call_operand.vmem [shape: f32[1,128], index: 2, kind: input, shape index: {}]   ;;  %s961_s3 = inlined_call_operand.hbm [shape: bf16[128,128], index: 3, kind: input, shape index: {}]   ;;  %s962_s4 = inlined_call_operand.vmem [shape: f32[1,128], index: 4, kind: input, shape index: {}]   ;;  %s963_s5 = inlined_call_operand.hbm [shape: f32[16,128], index: 5, kind: output, shape index: {}]  }
   0x1   :  { %12 = vsyncpa [#allocation3 + $0x1], 0 }
   0x2   :  { %13 = vsyncpa [#allocation6], 0 }
   0x3   :  { %14 = vsyncpa [#allocation4], 0 }
   0x4   :  { %16 = vsyncpa [#allocation4 + $0x1], 0  ;;  %s779_s18 = smov 0   ;;  %s781_s19 = smov 0  }
   0x5   :  { %s783_s20 = smov 0   ;;  %s785_s21 = smov 0  }
   0x6 LB: > { %s800_s22 = sadd.s32 4294967295, %s740_s21   ;;  %s493_s23 = sadd.s32 4294967294, %s740_s21   ;;  %s740_s21 = sphi %s785_s21, %s985_s21   ;;  %s736_s20 = sphi %s783_s20, %s984_s20   ;;  %s732_s19 = sphi %s781_s19, %s983_s19   ;;  %s728_s18 = sphi %s779_s18, %s982_s18  }
   0x7   : > { %p42_p0 = scmp.ne.s32.totalorder %s732_s19, %s728_s18  ;;  %p964_p1 = scmp.eq.s32.totalorder %s800_s22, 0 }
   0x8   : > { %p156_p3 = scmp.eq.s32.totalorder %s493_s23, 1  ;;  %p494_p5 = scmp.ge.s32.totalorder %s740_s21, 1 }
   0x9   : > { %p809_p4 = por %p964_p1, %p42_p0  ;;  %p163_p7 = scmp.lt.s32.totalorder %s740_s21, 3 }
   0xa   : > { %p814_p6 = por %p156_p3, %p42_p0  ;;  %s742_s27 = smov [#allocation5]  }
   0xb   : > { %s968_s24 = scalar_select %p809_p4, 1, 0 }
   0xc   : > { %s969_s25 = scalar_select %p814_p6, 1, 0 }
   0xd   : > { %p819_p8 = pnand %p494_p5, %p163_p7  ;;  %s181_s28 = sshll.u32 %s742_s27, 4  ;;  %s182_s28 = int_to_ptr.vmem [resolvable:$true] %s181_s28 }
   0xe   : > { %s833_s30 = sadd.s32 1, %s740_s21   ;;  %s29_s6 = sadd.s32 1, %s736_s20 }
   0xf   : > { %s970_s26 = scalar_select %p819_p8, 1, 0 }
  0x10   : > { %p555_p9 = pneg %p819_p8  ;;  %s26_s7 = ssub.s32 %s740_s21, %s833_s30 }
  0x11   : > { %s629_s8 = scalar_lea.vmem %s182_s28, 1024  ;;  %p637_p5 = scmp.lt.s32.totalorder %s182_s28, %s182_s28 }
  0x12   : > { %p828_p11 = pnand %p555_p9, %p964_p1  ;;  %p630_p13 = scmp.ne.s32.totalorder %s182_s28, %s629_s8 }
  0x13   : > { %p638_p7 = scmp.lt.s32.totalorder %s629_s8, %s629_s8 }
  0x14   : > { %p620_p12 = pneg %p828_p11 }
  0x15   : > { %p639_p10 = por %p638_p7, %p637_p5 }
  0x16   : > { %p632_p0 = pnand %p630_p13, %p620_p12 }
  0x18   : > { %p633_p3 = pneg %p632_p0 }
  0x1a   : > { %p640_p2 = pnand %p639_p10, %p633_p3 }
  0x1c   : > { %643 = shalt.err (!%p640_p2)
}
  0x1d   : > { %s743_s9 = smov 64   ;;  %s744_s10 = smov 4  }
  0x1e   : > { %558 = dma.hbm_to_vmem [thread:$0]  (!%p828_p11), %s961_s3, 1024, %s182_s28, [#allocation6], %s743_s9, %s743_s9, %s744_s10  }
  0x1f   : > { %p27_p9 = scmp.eq.s32.totalorder %s26_s7, 0  ;;  %p36_p12 = scmp.ne.s32.totalorder %s736_s20, %s732_s19 }
  0x20   : > { %p37_p10 = scmp.eq.s32.totalorder %s740_s21, 0  ;;  %p568_p2 = scmp.lt.s32.totalorder %s740_s21, 2 }
  0x21   : > { %s850_s13 = scalar_select %p27_p9, %s736_s20, %s29_s6  }
  0x22   : > { %p38_p13 = por %p37_p10, %p36_p12  ;;  %p972_p0 = scmp.eq.s32.totalorder %s800_s22, 1 }
  0x23   : > { %s198_s15 = sand.u32 1, %s736_s20   ;;  %s498_s16 = sshll.u32 %s740_s21, 7 }
  0x24   : > { %p854_p3 = por %p972_p0, %p36_p12  ;;  %s497_s17 = sshll.u32 %s198_s15, 3 }
  0x25   : > { %s863_s29 = scalar_lea.hbm %s958_s0, %s498_s16  ;;  %s202_s28 = scalar_lea.vmem [#allocation2], %s497_s17 }
  0x26   : > { %s973_s14 = scalar_select %p854_p3, 1, 0 }
  0x27   : > { %s209_s6 = sshll.u32 %s202_s28, 4  ;;  %p865_p11 = pnand %p568_p2, %p38_p13  ;;  %s210_s6 = int_to_ptr.vmem [resolvable:$true] %s209_s6 }
  0x28   : > { %s199_s8 = scalar_lea.sflag [#allocation3], %s198_s15  ;;  %s644_s9 = scalar_lea.hbm %s863_s29, 128 }
  0x29   : > { %p645_p5 = scmp.ne.s32.totalorder %s863_s29, %s644_s9  ;;  %p646_p7 = pneg %p865_p11 }
  0x2a   : > { %s649_s12 = scalar_lea.hbm %s958_s0, 256  ;;  %p650_p10 = scmp.lt.s32.totalorder %s863_s29, %s958_s0 }
  0x2b   : > { %p647_p9 = pnand %p646_p7, %p645_p5  ;;  %p651_p2 = scmp.lt.s32.totalorder %s649_s12, %s644_s9 }
  0x2d   : > { %p648_p12 = pneg %p647_p9  ;;  %p652_p13 = por %p651_p2, %p650_p10 }
  0x2f   : > { %p653_p0 = pnand %p652_p13, %p648_p12 }
  0x31   : > { %656 = shalt.err (!%p653_p0)
}
  0x32   : > { %s657_s23 = scalar_lea.vmem %s210_s6, 128  ;;  %s745_s15 = smov [#allocation2]  }
  0x33   : > { %p658_p1 = scmp.ne.s32.totalorder %s210_s6, %s657_s23  ;;  %s662_s27 = sshll.u32 %s745_s15, 4  ;;  %s663_s27 = int_to_ptr.vmem [resolvable:$false] %s662_s27 }
  0x34   : > { %s664_s28 = scalar_lea.vmem %s663_s27, 256  ;;  %p665_p5 = scmp.lt.s32.totalorder %s210_s6, %s663_s27 }
  0x35   : > { %p660_p6 = pnand %p658_p1, %p646_p7  ;;  %p666_p9 = scmp.lt.s32.totalorder %s664_s28, %s657_s23 }
  0x37   : > { %p661_p3 = pneg %p660_p6  ;;  %p667_p4 = por %p666_p9, %p665_p5 }
  0x39   : > { %p668_p8 = pnand %p667_p4, %p661_p3 }
  0x3b   : > { %671 = shalt.err (!%p668_p8)
}
  0x3c   : > { %562 = dma.hbm_to_vmem [thread:$0]  (!%p865_p11), %s863_s29, 128, %s210_s6, %s199_s8  }
  0x3d   : > { %p975_p12 = scmp.ne.s32.totalorder %s970_s26, 0 }
  0x3e   : > { %s886_s9 = sand.u32 (!%p975_p12), 1, %s732_s19   ;;  %p976_p1 = scmp.ne.s32.totalorder (!%p975_p12), %s968_s24, 0 }
  0x3f   : > { %218 = sbr.rel (%p975_p12) target bundleno = 592 (0x250), region = 40  ;;  %s500_s10 = sshll.u32 (!%p975_p12), %s886_s9, 3 }
  0x40   : > { %s221_s11 = scalar_lea.sflag (!%p975_p12), [#allocation3], %s886_s9  ;;  %s224_s12 = scalar_lea.vmem (!%p975_p12), [#allocation2], %s500_s10 }
  0x44   : > { %715 = dma.done.wait (%p976_p1), %s221_s11, 128  }
  0x45   : > { %717 = vsyncadd (%p976_p1), %s221_s11, 4294967168  ;;  %p977_p4 = scmp.eq.s32.totalorder %s800_s22, 0 }
  0x47   : > { %719 = dma.done.wait (%p977_p4), [#allocation6], 1024   ;;  %p978_p6 = pmov %p977_p4 }
  0x48   : > { %v256_v0 = vld [vmem:[%s224_s12] sm:$0xff]  ;;  %v746_v2 = vmov 0.0   ;;  %v610_v8 = vld [vmem:[#allocation5 + $0x28] sm:$0xff]   ;;  %v611_v9 = vld [vmem:[#allocation5 + $0x20] sm:$0xff]   ;;  %vm747_vm0 = vmmov 0   ;;  %s515_s16 = sshll.u32 %s800_s22, 7 }
  0x49   : > { %721 = vsyncadd (%p978_p6), [#allocation6], 4294966272  ;;  %257 = vadd.xlane.f32.xlu0 %v256_v0  ;;  %v608_v1 = vld [vmem:[#allocation5 + $0x38] sm:$0xff]   ;;  %527 = vmatprep.subr.bf16.mxu0 %v746_v2  ;;  %v609_v3 = vld [vmem:[#allocation5 + $0x30] sm:$0xff]   ;;  %s254_s17 = scalar_lea.vmem [#allocation7], %s500_s10  ;;  %s915_s28 = scalar_lea.hbm %s963_s5, %s515_s16 }
  0x4a   : > { %528 = vmatpush3.bf16.msra.mxu0 %v608_v1  ;;  %543 = vmatprep.mubr.msk.bf16.mxu0 %vm747_vm0, %v746_v2  ;;  %v612_v10 = vld [vmem:[#allocation5 + $0x18] sm:$0xff]   ;;  %v613_v11 = vld [vmem:[#allocation5 + $0x10] sm:$0xff]   ;;  %v614_v12 = vld [vmem:[#allocation5 + $0x8] sm:$0xff]   ;;  %s413_s23 = sshll.u32 %s254_s17, 4  ;;  %s400_s22 = scalar_lea.sflag [#allocation4], %s886_s9  ;;  %s917_s23 = int_to_ptr.vmem [resolvable:$true] %s413_s23 }
  0x4b   : > { %529 = vmatprep.subr.bf16.mxu0 %v746_v2  ;;  %v615_v13 = vld [vmem:[#allocation5] sm:$0xff]   ;;  %v503_v18 = vld [vmem:[%s959_s1] ss:$0 sm:$0xff]  ;;  %s672_s11 = scalar_lea.vmem %s917_s23, 128  ;;  %p979_p3 = scmp.ne.s32.totalorder %s973_s14, 0 }
  0x4c   : > { %v504_v20 = vld [vmem:[%s960_s2] ss:$0 sm:$0xff]  ;;  %p673_p8 = scmp.ne.s32.totalorder %s917_s23, %s672_s11  ;;  %s748_s10 = smov [#allocation7]  }
  0x4d   : > { %v505_v24 = vld [vmem:[%s962_s4] ss:$0 sm:$0xff]  ;;  %s676_s12 = sshll.u32 %s748_s10, 4  ;;  %s677_s12 = int_to_ptr.vmem [resolvable:$false] %s676_s12 }
  0x4e   : > { %530 = vmatpush3.bf16.msra.mxu0 %v609_v3  ;;  %p674_p11 = pnand %p673_p8, %p979_p3  ;;  %s678_s24 = scalar_lea.vmem %s677_s12, 256 }
  0x4f   : > { %531 = vmatprep.subr.bf16.mxu0 %v746_v2  ;;  %p679_p10 = scmp.lt.s32.totalorder %s917_s23, %s677_s12  ;;  %p680_p2 = scmp.lt.s32.totalorder %s678_s24, %s672_s11 }
  0x50   : > { %p675_p7 = pneg %p674_p11 }
  0x51   : > { %p681_p13 = por %p680_p2, %p679_p10 }
  0x52   : > { %532 = vmatpush3.bf16.msra.mxu0 %v610_v8 }
  0x53   : > { %533 = vmatprep.subr.bf16.mxu0 %v746_v2  ;;  %p682_p0 = pnand %p681_p13, %p675_p7 }
  0x56   : > { %534 = vmatpush3.bf16.msra.mxu0 %v611_v9 }
  0x57   : > { %535 = vmatprep.subr.bf16.mxu0 %v746_v2 }
  0x5a   : > { %536 = vmatpush3.bf16.msra.mxu0 %v612_v10 }
  0x5b   : > { %537 = vmatprep.subr.bf16.mxu0 %v746_v2 }
  0x5e   : > { %538 = vmatpush3.bf16.msra.mxu0 %v613_v11 }
  0x5f   : > { %539 = vmatprep.subr.bf16.mxu0 %v746_v2 }
  0x62   : > { %540 = vmatpush3.bf16.msra.mxu0 %v614_v12 }
  0x63   : > { %541 = vmatprep.subr.bf16.mxu0 %v746_v2 }
  0x66   : > { %542 = vmatpush3.bf16.msra.mxu0 %v615_v13 }
  0xd2   : > { %v258_v4 = vpop.xlane.xlu0 %257 }
  0xd3   : > { %v260_v5 = vmul.f32 0.0078125, %v258_v4 }
  0xd5   : > { %v261_v6 = vsub.f32 %v256_v0, %v260_v5 }
  0xd7   : > { %v262_v7 = vmul.f32 %v261_v6, %v261_v6 }
  0xd9   : > { %263 = vadd.xlane.f32.xlu0 %v262_v7 }
 0x162   : > { %v264_v14 = vpop.xlane.xlu0 %263 }
 0x163   : > { %v265_v15 = vmul.f32 0.0078125, %v264_v14 }
 0x165   : > { %v266_v16 = vadd.f32 1e-06, %v265_v15 }
 0x167   : > { %616 = vrsqrt.f32 %v266_v16 }
 0x174   : > { %v617_v17 = vpop.eup %616 }
 0x175   : > { %v268_v19 = vmul.f32 %v617_v17, %v261_v6 }
 0x177   : > { %v276_v21 = vmul.f32 %v503_v18, %v268_v19 }
 0x179   : > { %v284_v22 = vadd.f32 %v504_v20, %v276_v21 }
 0x17b   : > { %v285_v23 = vpack.c.bf16 %v284_v22, %v284_v22 }
 0x17d   : > { %544 = vmatmul.mubr.bf16.vlgmr.msra.gmra.mxu0 %v285_v23 }
 0x23d   : > { %v391_v25 = vpop.f32.mrf.mxu0 }
 0x23e   : > { %v392_v26 = vadd.f32 %v505_v24, %v391_v25 }
 0x23f   : > { %v545_v27 = vpop.f32.mrf.mxu0 }
 0x240   : > { %v397_v28 = vadd.f32 %v392_v26, %v256_v0 }
 0x241   : > { %v394_v29 = vpop.f32.mrf.mxu0 }
 0x242   : > { %398 = vst [vmem:[%s254_s17] sm:$0xff] %v397_v28 }
 0x243   : > { %v546_v30 = vpop.f32.mrf.mxu0 }
 0x244   : > { %685 = shalt.err (!%p682_p0)
}
 0x245   : > { %s686_s26 = scalar_lea.hbm %s915_s28, 128  ;;  %s690_s6 = scalar_lea.hbm %s963_s5, 256 }
 0x246   : > { %p687_p5 = scmp.ne.s32.totalorder %s915_s28, %s686_s26  ;;  %p691_p1 = scmp.lt.s32.totalorder %s915_s28, %s963_s5 }
 0x247   : > { %p692_p4 = scmp.lt.s32.totalorder %s690_s6, %s686_s26 }
 0x248   : > { %p688_p9 = pnand %p687_p5, %p979_p3 }
 0x249   : > { %p693_p6 = por %p692_p4, %p691_p1 }
 0x24a   : > { %p689_p12 = pneg %p688_p9 }
 0x24c   : > { %p694_p8 = pnand %p693_p6, %p689_p12 }
 0x24e   : > { %697 = shalt.err (!%p694_p8)
}
 0x24f   : > { %553 = dma.vmem_to_hbm [thread:$0]  (%p979_p3), %s917_s23, 128, %s915_s28, %s400_s22  }
 0x250 PF: > { %s425_s16 = sand.u32 1, %s728_s18   ;;  %p980_p11 = scmp.ne.s32.totalorder %s969_s25, 0 }
 0x251   : > { %p981_p7 = scmp.ge.s32.totalorder %s740_s21, 2  ;;  %s426_s17 = scalar_lea.sflag [#allocation4], %s425_s16 }
 0x253   : > { %p564_p10 = pnand %p981_p7, %p980_p11 }
 0x255   : > { %p565_p2 = pneg %p564_p10 }
 0x257   : > { %723 = dma.done.wait (%p565_p2), %s426_s17, 128  }
 0x258   : > { %725 = vsyncadd (%p565_p2), %s426_s17, 4294967168  ;;  %p19_p13 = scmp.ge.s32.totalorder %s833_s30, 4   ;;  %s982_s18 = smov %s732_s19 }
 0x259   : > { %s983_s19 = smov %s736_s20  ;;  %s984_s20 = smov %s850_s13 }
 0x25a   : > { %s985_s21 = smov %s833_s30  ;;  %21 = sbr.rel (!%p19_p13) target bundleno = 6 (0x6), region = 89 }
 0x25f   :  { %431 = vsyncpa [#allocation3], 1 }
 0x260   :  { %433 = vsyncpa [#allocation3 + $0x1], 1 }
 0x261   :  { %434 = vsyncpa [#allocation6], 1 }
 0x262   :  { %435 = vsyncpa [#allocation4], 1 }
 0x263   :  { %437 = vsyncpa [#allocation4 + $0x1], 1 }

// kernel: tpu_custom_call.1
= control target key start
LH: loop header
LB: loop body
LE: loop exit
PB: predicated region body
PF: predicated region fallthrough
CT: control target
= control target key end

     0   :  { %10 = vsyncpa [#allocation3], 0  ;;  %s958_s0 = inlined_call_operand.hbm [shape: f32[16,128], index: 0, kind: input, shape index: {}]   ;;  %s959_s1 = inlined_call_operand.vmem [shape: f32[1,128], index: 1, kind: input, shape index: {}]   ;;  %s960_s2 = inlined_call_operand.vmem [shape: f32[1,128], index: 2, kind: input, shape index: {}]   ;;  %s961_s3 = inlined_call_operand.hbm [shape: bf16[128,128], index: 3, kind: input, shape index: {}]   ;;  %s962_s4 = inlined_call_operand.vmem [shape: f32[1,128], index: 4, kind: input, shape index: {}]   ;;  %s963_s5 = inlined_call_operand.hbm [shape: f32[16,128], index: 5, kind: output, shape index: {}]  }
   0x1   :  { %12 = vsyncpa [#allocation3 + $0x1], 0 }
   0x2   :  { %13 = vsyncpa [#allocation6], 0 }
   0x3   :  { %14 = vsyncpa [#allocation4], 0 }
   0x4   :  { %16 = vsyncpa [#allocation4 + $0x1], 0  ;;  %s779_s18 = smov 0   ;;  %s781_s19 = smov 0  }
   0x5   :  { %s783_s20 = smov 0   ;;  %s785_s21 = smov 0  }
   0x6 LB: > { %s800_s22 = sadd.s32 4294967295, %s740_s21   ;;  %s493_s23 = sadd.s32 4294967294, %s740_s21   ;;  %s740_s21 = sphi %s785_s21, %s985_s21   ;;  %s736_s20 = sphi %s783_s20, %s984_s20   ;;  %s732_s19 = sphi %s781_s19, %s983_s19   ;;  %s728_s18 = sphi %s779_s18, %s982_s18  }
   0x7   : > { %p42_p0 = scmp.ne.s32.totalorder %s732_s19, %s728_s18  ;;  %p964_p1 = scmp.eq.s32.totalorder %s800_s22, 0 }
   0x8   : > { %p156_p3 = scmp.eq.s32.totalorder %s493_s23, 1  ;;  %p494_p5 = scmp.ge.s32.totalorder %s740_s21, 1 }
   0x9   : > { %p809_p4 = por %p964_p1, %p42_p0  ;;  %p163_p7 = scmp.lt.s32.totalorder %s740_s21, 3 }
   0xa   : > { %p814_p6 = por %p156_p3, %p42_p0  ;;  %s742_s27 = smov [#allocation5]  }
   0xb   : > { %s968_s24 = scalar_select %p809_p4, 1, 0 }
   0xc   : > { %s969_s25 = scalar_select %p814_p6, 1, 0 }
   0xd   : > { %p819_p8 = pnand %p494_p5, %p163_p7  ;;  %s181_s28 = sshll.u32 %s742_s27, 4  ;;  %s182_s28 = int_to_ptr.vmem [resolvable:$true] %s181_s28 }
   0xe   : > { %s833_s30 = sadd.s32 1, %s740_s21   ;;  %s29_s6 = sadd.s32 1, %s736_s20 }
   0xf   : > { %s970_s26 = scalar_select %p819_p8, 1, 0 }
  0x10   : > { %p555_p9 = pneg %p819_p8  ;;  %s26_s7 = ssub.s32 %s740_s21, %s833_s30 }
  0x11   : > { %s629_s8 = scalar_lea.vmem %s182_s28, 1024  ;;  %p637_p5 = scmp.lt.s32.totalorder %s182_s28, %s182_s28 }
  0x12   : > { %p828_p11 = pnand %p555_p9, %p964_p1  ;;  %p630_p13 = scmp.ne.s32.totalorder %s182_s28, %s629_s8 }
  0x13   : > { %p638_p7 = scmp.lt.s32.totalorder %s629_s8, %s629_s8 }
  0x14   : > { %p620_p12 = pneg %p828_p11 }
  0x15   : > { %p639_p10 = por %p638_p7, %p637_p5 }
  0x16   : > { %p632_p0 = pnand %p630_p13, %p620_p12 }
  0x18   : > { %p633_p3 = pneg %p632_p0 }
  0x1a   : > { %p640_p2 = pnand %p639_p10, %p633_p3 }
  0x1c   : > { %643 = shalt.err (!%p640_p2)
}
  0x1d   : > { %s743_s9 = smov 64   ;;  %s744_s10 = smov 4  }
  0x1e   : > { %558 = dma.hbm_to_vmem [thread:$0]  (!%p828_p11), %s961_s3, 1024, %s182_s28, [#allocation6], %s743_s9, %s743_s9, %s744_s10  }
  0x1f   : > { %p27_p9 = scmp.eq.s32.totalorder %s26_s7, 0  ;;  %p36_p12 = scmp.ne.s32.totalorder %s736_s20, %s732_s19 }
  0x20   : > { %p37_p10 = scmp.eq.s32.totalorder %s740_s21, 0  ;;  %p568_p2 = scmp.lt.s32.totalorder %s740_s21, 2 }
  0x21   : > { %s850_s13 = scalar_select %p27_p9, %s736_s20, %s29_s6  }
  0x22   : > { %p38_p13 = por %p37_p10, %p36_p12  ;;  %p972_p0 = scmp.eq.s32.totalorder %s800_s22, 1 }
  0x23   : > { %s198_s15 = sand.u32 1, %s736_s20   ;;  %s498_s16 = sshll.u32 %s740_s21, 7 }
  0x24   : > { %p854_p3 = por %p972_p0, %p36_p12  ;;  %s497_s17 = sshll.u32 %s198_s15, 3 }
  0x25   : > { %s863_s29 = scalar_lea.hbm %s958_s0, %s498_s16  ;;  %s202_s28 = scalar_lea.vmem [#allocation2], %s497_s17 }
  0x26   : > { %s973_s14 = scalar_select %p854_p3, 1, 0 }
  0x27   : > { %s209_s6 = sshll.u32 %s202_s28, 4  ;;  %p865_p11 = pnand %p568_p2, %p38_p13  ;;  %s210_s6 = int_to_ptr.vmem [resolvable:$true] %s209_s6 }
  0x28   : > { %s199_s8 = scalar_lea.sflag [#allocation3], %s198_s15  ;;  %s644_s9 = scalar_lea.hbm %s863_s29, 128 }
  0x29   : > { %p645_p5 = scmp.ne.s32.totalorder %s863_s29, %s644_s9  ;;  %p646_p7 = pneg %p865_p11 }
  0x2a   : > { %s649_s12 = scalar_lea.hbm %s958_s0, 256  ;;  %p650_p10 = scmp.lt.s32.totalorder %s863_s29, %s958_s0 }
  0x2b   : > { %p647_p9 = pnand %p646_p7, %p645_p5  ;;  %p651_p2 = scmp.lt.s32.totalorder %s649_s12, %s644_s9 }
  0x2d   : > { %p648_p12 = pneg %p647_p9  ;;  %p652_p13 = por %p651_p2, %p650_p10 }
  0x2f   : > { %p653_p0 = pnand %p652_p13, %p648_p12 }
  0x31   : > { %656 = shalt.err (!%p653_p0)
}
  0x32   : > { %s657_s23 = scalar_lea.vmem %s210_s6, 128  ;;  %s745_s15 = smov [#allocation2]  }
  0x33   : > { %p658_p1 = scmp.ne.s32.totalorder %s210_s6, %s657_s23  ;;  %s662_s27 = sshll.u32 %s745_s15, 4  ;;  %s663_s27 = int_to_ptr.vmem [resolvable:$false] %s662_s27 }
  0x34   : > { %s664_s28 = scalar_lea.vmem %s663_s27, 256  ;;  %p665_p5 = scmp.lt.s32.totalorder %s210_s6, %s663_s27 }
  0x35   : > { %p660_p6 = pnand %p658_p1, %p646_p7  ;;  %p666_p9 = scmp.lt.s32.totalorder %s664_s28, %s657_s23 }
  0x37   : > { %p661_p3 = pneg %p660_p6  ;;  %p667_p4 = por %p666_p9, %p665_p5 }
  0x39   : > { %p668_p8 = pnand %p667_p4, %p661_p3 }
  0x3b   : > { %671 = shalt.err (!%p668_p8)
}
  0x3c   : > { %562 = dma.hbm_to_vmem [thread:$0]  (!%p865_p11), %s863_s29, 128, %s210_s6, %s199_s8  }
  0x3d   : > { %p975_p12 = scmp.ne.s32.totalorder %s970_s26, 0 }
  0x3e   : > { %s886_s9 = sand.u32 (!%p975_p12), 1, %s732_s19   ;;  %p976_p1 = scmp.ne.s32.totalorder (!%p975_p12), %s968_s24, 0 }
  0x3f   : > { %218 = sbr.rel (%p975_p12) target bundleno = 592 (0x250), region = 40  ;;  %s500_s10 = sshll.u32 (!%p975_p12), %s886_s9, 3 }
  0x40   : > { %s221_s11 = scalar_lea.sflag (!%p975_p12), [#allocation3], %s886_s9  ;;  %s224_s12 = scalar_lea.vmem (!%p975_p12), [#allocation2], %s500_s10 }
  0x44   : > { %715 = dma.done.wait (%p976_p1), %s221_s11, 128  }
  0x45   : > { %717 = vsyncadd (%p976_p1), %s221_s11, 4294967168  ;;  %p977_p4 = scmp.eq.s32.totalorder %s800_s22, 0 }
  0x47   : > { %719 = dma.done.wait (%p977_p4), [#allocation6], 1024   ;;  %p978_p6 = pmov %p977_p4 }
  0x48   : > { %v256_v0 = vld [vmem:[%s224_s12] sm:$0xff]  ;;  %v746_v2 = vmov 0.0   ;;  %v610_v8 = vld [vmem:[#allocation5 + $0x28] sm:$0xff]   ;;  %v611_v9 = vld [vmem:[#allocation5 + $0x20] sm:$0xff]   ;;  %vm747_vm0 = vmmov 0   ;;  %s515_s16 = sshll.u32 %s800_s22, 7 }
  0x49   : > { %721 = vsyncadd (%p978_p6), [#allocation6], 4294966272  ;;  %257 = vadd.xlane.f32.xlu0 %v256_v0  ;;  %v608_v1 = vld [vmem:[#allocation5 + $0x38] sm:$0xff]   ;;  %527 = vmatprep.subr.bf16.mxu0 %v746_v2  ;;  %v609_v3 = vld [vmem:[#allocation5 + $0x30] sm:$0xff]   ;;  %s254_s17 = scalar_lea.vmem [#allocation7], %s500_s10  ;;  %s915_s28 = scalar_lea.hbm %s963_s5, %s515_s16 }
  0x4a   : > { %528 = vmatpush3.bf16.msra.mxu0 %v608_v1  ;;  %543 = vmatprep.mubr.msk.bf16.mxu0 %vm747_vm0, %v746_v2  ;;  %v612_v10 = vld [vmem:[#allocation5 + $0x18] sm:$0xff]   ;;  %v613_v11 = vld [vmem:[#allocation5 + $0x10] sm:$0xff]   ;;  %v614_v12 = vld [vmem:[#allocation5 + $0x8] sm:$0xff]   ;;  %s413_s23 = sshll.u32 %s254_s17, 4  ;;  %s400_s22 = scalar_lea.sflag [#allocation4], %s886_s9  ;;  %s917_s23 = int_to_ptr.vmem [resolvable:$true] %s413_s23 }
  0x4b   : > { %529 = vmatprep.subr.bf16.mxu0 %v746_v2  ;;  %v615_v13 = vld [vmem:[#allocation5] sm:$0xff]   ;;  %v503_v18 = vld [vmem:[%s959_s1] ss:$0 sm:$0xff]  ;;  %s672_s11 = scalar_lea.vmem %s917_s23, 128  ;;  %p979_p3 = scmp.ne.s32.totalorder %s973_s14, 0 }
  0x4c   : > { %v504_v20 = vld [vmem:[%s960_s2] ss:$0 sm:$0xff]  ;;  %p673_p8 = scmp.ne.s32.totalorder %s917_s23, %s672_s11  ;;  %s748_s10 = smov [#allocation7]  }
  0x4d   : > { %v505_v24 = vld [vmem:[%s962_s4] ss:$0 sm:$0xff]  ;;  %s676_s12 = sshll.u32 %s748_s10, 4  ;;  %s677_s12 = int_to_ptr.vmem [resolvable:$false] %s676_s12 }
  0x4e   : > { %530 = vmatpush3.bf16.msra.mxu0 %v609_v3  ;;  %p674_p11 = pnand %p673_p8, %p979_p3  ;;  %s678_s24 = scalar_lea.vmem %s677_s12, 256 }
  0x4f   : > { %531 = vmatprep.subr.bf16.mxu0 %v746_v2  ;;  %p679_p10 = scmp.lt.s32.totalorder %s917_s23, %s677_s12  ;;  %p680_p2 = scmp.lt.s32.totalorder %s678_s24, %s672_s11 }
  0x50   : > { %p675_p7 = pneg %p674_p11 }
  0x51   : > { %p681_p13 = por %p680_p2, %p679_p10 }
  0x52   : > { %532 = vmatpush3.bf16.msra.mxu0 %v610_v8 }
  0x53   : > { %533 = vmatprep.subr.bf16.mxu0 %v746_v2  ;;  %p682_p0 = pnand %p681_p13, %p675_p7 }
  0x56   : > { %534 = vmatpush3.bf16.msra.mxu0 %v611_v9 }
  0x57   : > { %535 = vmatprep.subr.bf16.mxu0 %v746_v2 }
  0x5a   : > { %536 = vmatpush3.bf16.msra.mxu0 %v612_v10 }
  0x5b   : > { %537 = vmatprep.subr.bf16.mxu0 %v746_v2 }
  0x5e   : > { %538 = vmatpush3.bf16.msra.mxu0 %v613_v11 }
  0x5f   : > { %539 = vmatprep.subr.bf16.mxu0 %v746_v2 }
  0x62   : > { %540 = vmatpush3.bf16.msra.mxu0 %v614_v12 }
  0x63   : > { %541 = vmatprep.subr.bf16.mxu0 %v746_v2 }
  0x66   : > { %542 = vmatpush3.bf16.msra.mxu0 %v615_v13 }
  0xd2   : > { %v258_v4 = vpop.xlane.xlu0 %257 }
  0xd3   : > { %v260_v5 = vmul.f32 0.0078125, %v258_v4 }
  0xd5   : > { %v261_v6 = vsub.f32 %v256_v0, %v260_v5 }
  0xd7   : > { %v262_v7 = vmul.f32 %v261_v6, %v261_v6 }
  0xd9   : > { %263 = vadd.xlane.f32.xlu0 %v262_v7 }
 0x162   : > { %v264_v14 = vpop.xlane.xlu0 %263 }
 0x163   : > { %v265_v15 = vmul.f32 0.0078125, %v264_v14 }
 0x165   : > { %v266_v16 = vadd.f32 1e-06, %v265_v15 }
 0x167   : > { %616 = vrsqrt.f32 %v266_v16 }
 0x174   : > { %v617_v17 = vpop.eup %616 }
 0x175   : > { %v268_v19 = vmul.f32 %v617_v17, %v261_v6 }
 0x177   : > { %v276_v21 = vmul.f32 %v503_v18, %v268_v19 }
 0x179   : > { %v284_v22 = vadd.f32 %v504_v20, %v276_v21 }
 0x17b   : > { %v285_v23 = vpack.c.bf16 %v284_v22, %v284_v22 }
 0x17d   : > { %544 = vmatmul.mubr.bf16.vlgmr.msra.gmra.mxu0 %v285_v23 }
 0x23d   : > { %v391_v25 = vpop.f32.mrf.mxu0 }
 0x23e   : > { %v392_v26 = vadd.f32 %v505_v24, %v391_v25 }
 0x23f   : > { %v545_v27 = vpop.f32.mrf.mxu0 }
 0x240   : > { %v397_v28 = vadd.f32 %v392_v26, %v256_v0 }
 0x241   : > { %v394_v29 = vpop.f32.mrf.mxu0 }
 0x242   : > { %398 = vst [vmem:[%s254_s17] sm:$0xff] %v397_v28 }
 0x243   : > { %v546_v30 = vpop.f32.mrf.mxu0 }
 0x244   : > { %685 = shalt.err (!%p682_p0)
}
 0x245   : > { %s686_s26 = scalar_lea.hbm %s915_s28, 128  ;;  %s690_s6 = scalar_lea.hbm %s963_s5, 256 }
 0x246   : > { %p687_p5 = scmp.ne.s32.totalorder %s915_s28, %s686_s26  ;;  %p691_p1 = scmp.lt.s32.totalorder %s915_s28, %s963_s5 }
 0x247   : > { %p692_p4 = scmp.lt.s32.totalorder %s690_s6, %s686_s26 }
 0x248   : > { %p688_p9 = pnand %p687_p5, %p979_p3 }
 0x249   : > { %p693_p6 = por %p692_p4, %p691_p1 }
 0x24a   : > { %p689_p12 = pneg %p688_p9 }
 0x24c   : > { %p694_p8 = pnand %p693_p6, %p689_p12 }
 0x24e   : > { %697 = shalt.err (!%p694_p8)
}
 0x24f   : > { %553 = dma.vmem_to_hbm [thread:$0]  (%p979_p3), %s917_s23, 128, %s915_s28, %s400_s22  }
 0x250 PF: > { %s425_s16 = sand.u32 1, %s728_s18   ;;  %p980_p11 = scmp.ne.s32.totalorder %s969_s25, 0 }
 0x251   : > { %p981_p7 = scmp.ge.s32.totalorder %s740_s21, 2  ;;  %s426_s17 = scalar_lea.sflag [#allocation4], %s425_s16 }
 0x253   : > { %p564_p10 = pnand %p981_p7, %p980_p11 }
 0x255   : > { %p565_p2 = pneg %p564_p10 }
 0x257   : > { %723 = dma.done.wait (%p565_p2), %s426_s17, 128  }
 0x258   : > { %725 = vsyncadd (%p565_p2), %s426_s17, 4294967168  ;;  %p19_p13 = scmp.ge.s32.totalorder %s833_s30, 4   ;;  %s982_s18 = smov %s732_s19 }
 0x259   : > { %s983_s19 = smov %s736_s20  ;;  %s984_s20 = smov %s850_s13 }
 0x25a   : > { %s985_s21 = smov %s833_s30  ;;  %21 = sbr.rel (!%p19_p13) target bundleno = 6 (0x6), region = 89 }
 0x25f   :  { %431 = vsyncpa [#allocation3], 1 }
 0x260   :  { %433 = vsyncpa [#allocation3 + $0x1], 1 }
 0x261   :  { %434 = vsyncpa [#allocation6], 1 }
 0x262   :  { %435 = vsyncpa [#allocation4], 1 }
 0x263   :  { %437 = vsyncpa [#allocation4 + $0x1], 1 }

</bundles_post_ra>
